<compile_context>
chip_gen: v7x
topology: tpu7x:2x2x1
jax: 0.10.0
libtpu: 0.0.40
codegen_flags: <defaults>
</compile_context>

<pallas_src>
import math

import jax
import jax.numpy as jnp
from jax.experimental import pallas as pl
from jax.experimental.pallas import tpu as pltpu


def _round_up(x, m):
    return (x + m - 1) // m * m


def _cdiv(a, b):
    return (a + b - 1) // b


def _vmem_budgets():
    """(vmem_limit_bytes, per-call tile budget, weight-resident threshold)."""
    vmem_phys = None
    try:
        info = pltpu.get_tpu_info()
        for attr in ("vmem_capacity_bytes", "vmem_bytes", "vmem_size_bytes"):
            v = getattr(info, attr, None)
            if v:
                vmem_phys = int(v)
                break
    except Exception:
        pass
    if vmem_phys is None:
        vmem_phys = 64 * 1024 * 1024            # conservative: assume v7x
    if vmem_phys >= 128 * 1024 * 1024:          # v5e / v6e (128 MiB physical)
        return 100 << 20, 80 << 20, 28 << 20
    return 48 << 20, 36 << 20, 14 << 20         # v7x (64 MiB physical)


def _pick_tk(K, E, cf, target=512):
    """Exact divisor of K, multiple of 128 (lane constraint), preferring
    multiples of E so K blocks align to natural cf*E boundaries."""
    if E % 128 == 0:
        for d in range(1, cf + 1):
            if cf % d == 0 and d * E >= target:
                return d * E
        return K
    for t in range(128, K, 128):
        if K % t == 0 and t >= target:
            return t
    return K


# ----------------------------- kernels --------------------------------------


def _compress_kv_kernel_single(x_ref, w_ref, b_ref, o_ref):
    """Weight-resident fast path: one dot per (TM, N) output tile, no scratch.

    x_ref: [TM, K] (HBM dtype, cast in-kernel), w_ref: [K, N] compute dtype,
    b_ref: [1, N] f32, o_ref: [TM, N] output dtype.
    """
    acc = jnp.dot(x_ref[...].astype(w_ref.dtype), w_ref[...],
                  preferred_element_type=jnp.float32)
    o_ref[...] = (acc + b_ref[...]).astype(o_ref.dtype)


def _compress_kv_kernel_ktiled(x_ref, w_ref, b_ref, o_ref, acc_ref):
    """K-tiled path with f32 VMEM accumulator; bias folded into the init."""
    k = pl.program_id(1)

    @pl.when(k == 0)
    def _():
        acc_ref[...] = jnp.broadcast_to(b_ref[...], acc_ref.shape)

    acc_ref[...] += jnp.dot(x_ref[...].astype(w_ref.dtype), w_ref[...],
                            preferred_element_type=jnp.float32)

    @pl.when(k == pl.num_programs(1) - 1)
    def _():
        o_ref[...] = acc_ref[...].astype(o_ref.dtype)


# ----------------------------- wrapper ---------------------------------------


def prepare_compress_kv_weights(weight, bias, compress_factor,
                                compute_dtype=jnp.bfloat16):
    """One-time weight re-layout; hoist out of the per-forward/decode path.

    weight: [E_out, E_in, cf] (PyTorch Conv1d layout) -> w2:[cf*E_in, N_pad]
    bias:   [E_out]                                   -> b2:[1, N_pad] (f32)
    N_pad = round_up(E_out, 128) so the kernel's output stores are lane-dense.
    """
    e_out, e_in, cf = weight.shape
    assert cf == compress_factor
    # TODO(synk): pad N to 256 on v6e/v7x when the kernel is compute-bound
    # (weight resident, large E) to fill the 256-wide MXU.
    n_pad = _round_up(e_out, 128)
    # row index = k*E_in + e_in — matches the (cf, E) flattening of x below.
    w2 = jnp.transpose(weight, (2, 1, 0)).reshape(cf * e_in, e_out)
    b2 = bias
    if n_pad != e_out:
        w2 = jnp.pad(w2, ((0, 0), (0, n_pad - e_out)))
        b2 = jnp.pad(b2, (0, n_pad - e_out))
    return {
        "w2": w2.astype(compute_dtype),
        "b2": b2.astype(jnp.float32).reshape(1, n_pad),
        "e_out": e_out,
        "e_in": e_in,
        "cf": cf,
    }


def compress_kv_forward(x, weight=None, bias=None, compress_factor=None, *,
                        prepared=None, compute_dtype=jnp.bfloat16,
                        tk=None, tm=None, use_buffered_weights=True):
    """
    x:      [B, S, E]
    weight: [E_out, E_in, cf]  (PyTorch Conv1d weight layout), E_in == E
    bias:   [E_out]
    prepared: optional output of prepare_compress_kv_weights() (hoisted layout)
    returns [B, ceil(S/cf), E_out]  in x.dtype
    """
    if prepared is None:
        prepared = prepare_compress_kv_weights(weight, bias, compress_factor,
                                               compute_dtype)
    w2, b2 = prepared["w2"], prepared["b2"]
    e_out, e_in, cf = prepared["e_out"], prepared["e_in"], prepared["cf"]

    B, S, E = x.shape
    assert E == e_in
    out_dtype = x.dtype
    N = w2.shape[1]                               # multiple of 128
    K = cf * E

    s_main, rem = divmod(S, cf)

    # Ragged tail (< cf rows per batch): tiny matmul outside the kernel —
    # avoids a full-tensor HBM pad copy of x just to append < cf zero rows.
    out_tail = None
    if rem:
        x_tail = x[:, s_main * cf:, :].reshape(B, rem * E)
        tail = jnp.dot(x_tail.astype(w2.dtype), w2[:rem * E, :],
                       preferred_element_type=jnp.float32) + b2[0]
        out_tail = tail[:, :e_out].astype(out_dtype)[:, None, :]
        if s_main == 0:
            return out_tail

    M = B * s_main
    x2 = x[:, :s_main * cf, :].reshape(M, K) if rem else x.reshape(M, K)
    x_bytes = x2.dtype.itemsize                   # x stays in HBM dtype
    c_bytes = jnp.dtype(w2.dtype).itemsize
    o_bytes = jnp.dtype(out_dtype).itemsize

    vmem_limit, tile_budget, weight_resident = _vmem_budgets()

    # ---- K tiling: only when the weight slab is too big to keep resident ----
    TK = K
    if tk is not None:
        if tk < K and K % tk == 0 and tk % 128 == 0:
            TK = tk
    elif K * N * c_bytes > weight_resident:
        TK = _pick_tk(K, E, cf)
    num_k = K // TK
    single = num_k == 1

    # ---- M tiling: biggest MXU-aligned tile that fits the VMEM budget -------
    def vmem_estimate(tm_):
        w_bufs = 1 if (single and use_buffered_weights) else 2
        vm = (2 * tm_ * TK * x_bytes              # double-buffered x tiles
              + w_bufs * TK * N * c_bytes         # weight tiles
              + w_bufs * N * 4                    # bias
              + 2 * tm_ * N * o_bytes)            # double-buffered output tiles
        if not single:
            vm += tm_ * N * 4                     # f32 accumulator scratch
        return vm

    if tm is not None:
        TM = _round_up(min(tm, max(M, 16)), 16)
    else:
        TM = 1024
        while TM > 128 and vmem_estimate(TM) > tile_budget:
            TM //= 2
        TM = min(TM, _round_up(M, 16))            # small-M clamp (bf16 vreg=16 rows)
        if M >= 512:                              # keep >=2 (ideally 4) M blocks so
            TM = min(TM, max(256, _round_up(_cdiv(M, 4), 256)))  # v7x's 2 TCs share
    num_m = _cdiv(M, TM)

    cost = pl.CostEstimate(
        flops=2 * M * K * N,
        transcendentals=0,
        bytes_accessed=(M * K * x_bytes
                        + (num_m if not single else 1) * K * N * c_bytes
                        + M * N * o_bytes),
    )

    if single:
        def build(buffered):
            pm = dict(pipeline_mode=pl.Buffered(1)) if buffered else {}
            return pl.pallas_call(
                _compress_kv_kernel_single,
                out_shape=jax.ShapeDtypeStruct((M, N), out_dtype),
                grid=(num_m,),
                in_specs=[
                    pl.BlockSpec((TM, K), lambda i: (i, 0)),
                    pl.BlockSpec((K, N), lambda i: (0, 0), **pm),
                    pl.BlockSpec((1, N), lambda i: (0, 0), **pm),
                ],
                out_specs=pl.BlockSpec((TM, N), lambda i: (i, 0)),
                compiler_params=pltpu.CompilerParams(
                    dimension_semantics=("parallel",),
                    vmem_limit_bytes=vmem_limit,
                ),
                cost_estimate=cost,
            )

        if use_buffered_weights and hasattr(pl, "Buffered"):
            try:
                out2 = jax.block_until_ready(build(True)(x2, w2, b2))
            except Exception:
                # Older jax / lowering reject of pipeline_mode: plain specs.
                out2 = build(False)(x2, w2, b2)
        else:
            out2 = build(False)(x2, w2, b2)
    else:
        out2 = pl.pallas_call(
            _compress_kv_kernel_ktiled,
            out_shape=jax.ShapeDtypeStruct((M, N), out_dtype),
            grid=(num_m, num_k),
            in_specs=[
                pl.BlockSpec((TM, TK), lambda i, k: (i, k)),
                pl.BlockSpec((TK, N), lambda i, k: (k, 0)),
                pl.BlockSpec((1, N), lambda i, k: (0, 0)),
            ],
            out_specs=pl.BlockSpec((TM, N), lambda i, k: (i, 0)),
            scratch_shapes=[pltpu.VMEM((TM, N), jnp.float32)],
            compiler_params=pltpu.CompilerParams(
                dimension_semantics=("parallel", "arbitrary"),
                vmem_limit_bytes=vmem_limit,
            ),
            cost_estimate=cost,
        )(x2, w2, b2)

    out2 = out2[:, :e_out] if N != e_out else out2
    out_main = out2.reshape(B, s_main, e_out)
    if out_tail is not None:
        return jnp.concatenate([out_main, out_tail], axis=1)
    return out_main


# ----------------------------- reference & demo ------------------------------


def _reference_forward(x, weight, bias, cf):
    """Pure-JAX reference mirroring the PyTorch module exactly (f32)."""
    B, S, E = x.shape
    pad_amt = (-S) % cf
    xp = jnp.pad(x, ((0, 0), (0, pad_amt), (0, 0)))
    s_out = xp.shape[1] // cf
    xp = xp.reshape(B, s_out, cf, E)
    return jnp.einsum("btke,oek->bto", xp, weight) + bias[None, None, :]


def _make_params(key, E, cf):
    k_w, k_b = jax.random.split(key)
    fan_in = E * cf
    bound = 1.0 / math.sqrt(fan_in)
    weight = jax.random.uniform(k_w, (E, E, cf), dtype=jnp.float32,
                                minval=-bound, maxval=bound)
    bias = jax.random.uniform(k_b, (E,), dtype=jnp.float32,
                              minval=-bound, maxval=bound)
    return weight, bias


if __name__ == "__main__":
    key = jax.random.PRNGKey(0)
    k1, k2, k3, k4 = jax.random.split(key, 4)

    # --- case 1: small E (lane-pad path), ragged tail (S % cf != 0), f32 ----
    B, S, E, cf = 2, 8, 32, 3
    x = jax.random.normal(k1, (B, S, E), dtype=jnp.float32)
    weight, bias = _make_params(k2, E, cf)
    ref = _reference_forward(x, weight, bias, cf)

    out_f32 = jax.block_until_ready(
        compress_kv_forward(x, weight, bias, cf, compute_dtype=jnp.float32))
    assert out_f32.shape == (B, -(-S // cf), E), out_f32.shape
    assert jnp.allclose(out_f32, ref, atol=1e-4, rtol=1e-4), "f32 mismatch"

    # --- case 2: default bf16 MXU path with hoisted weight layout -----------
    prep_bf16 = prepare_compress_kv_weights(weight, bias, cf)
    out_bf16 = jax.block_until_ready(
        compress_kv_forward(x, prepared=prep_bf16))
    assert jnp.allclose(out_bf16, ref, atol=3e-2, rtol=3e-2), "bf16 mismatch"

    # --- case 3: K-tiled accumulator path (forced TK), S % cf == 0, f32 -----
    B3, S3, E3, cf3 = 2, 8, 128, 4
    x3 = jax.random.normal(k3, (B3, S3, E3), dtype=jnp.float32)
    w3, b3 = _make_params(jax.random.fold_in(key, 7), E3, cf3)
    out3 = jax.block_until_ready(
        compress_kv_forward(x3, w3, b3, cf3, compute_dtype=jnp.float32, tk=128))
    ref3 = _reference_forward(x3, w3, b3, cf3)
    assert out3.shape == (B3, S3 // cf3, E3), out3.shape
    assert jnp.allclose(out3, ref3, atol=1e-4, rtol=1e-4), "K-tiled mismatch"

    # --- case 4: partial final M block (M % TM != 0) + ragged tail, f32 -----
    B4, S4, E4, cf4 = 2, 40, 32, 3                 # M = 2*13 = 26, TM forced 16
    x4 = jax.random.normal(k4, (B4, S4, E4), dtype=jnp.float32)
    w4, b4 = _make_params(jax.random.fold_in(key, 11), E4, cf4)
    out4 = jax.block_until_ready(
        compress_kv_forward(x4, w4, b4, cf4, compute_dtype=jnp.float32, tm=16))
    ref4 = _reference_forward(x4, w4, b4, cf4)
    assert out4.shape == (B4, -(-S4 // cf4), E4), out4.shape
    assert jnp.allclose(out4, ref4, atol=1e-4, rtol=1e-4), "partial-M mismatch"

    print("KERNEL_OK")
</pallas_src>

<mosaic_0001>
module attributes {stable_mosaic.version = 11 : i64} {
  func.func @_compress_kv_kernel_single(%arg0: i32, %arg1: memref<16x96xf32, #tpu.memory_space<vmem>>, %arg2: memref<96x128xf32, #tpu.memory_space<vmem>>, %arg3: memref<1x128xf32, #tpu.memory_space<vmem>>, %arg4: memref<16x128xf32, #tpu.memory_space<vmem>>) attributes {dimension_semantics = [#tpu.dimension_semantics<parallel>], iteration_bounds = array<i64: 1>, scalar_prefetch = 0 : i64, scratch_operands = 0 : i64, tpu.core_type = #tpu.core_type<tc>, window_params = [{transform_indices = @transform_0, window_bounds = array<i64: 16, 96>}, {pipeline_mode = #tpu.pipeline_mode<synchronous>, transform_indices = @transform_1, window_bounds = array<i64: 96, 128>}, {pipeline_mode = #tpu.pipeline_mode<synchronous>, transform_indices = @transform_2, window_bounds = array<i64: 1, 128>}, {transform_indices = @transform_3, window_bounds = array<i64: 16, 128>}]} {
    %c0 = arith.constant 0 : index
    %c0_0 = arith.constant 0 : index
    %0 = vector.load %arg1[%c0, %c0_0] : memref<16x96xf32, #tpu.memory_space<vmem>>, vector<16x96xf32>
    %c0_1 = arith.constant 0 : index
    %c0_2 = arith.constant 0 : index
    %1 = vector.load %arg2[%c0_1, %c0_2] : memref<96x128xf32, #tpu.memory_space<vmem>>, vector<96x128xf32>
    %cst = arith.constant dense<0.000000e+00> : vector<16x128xf32>
    %2 = tpu.matmul %0, %1, %cst {dimension_numbers = #tpu.dot_dimension_numbers<[1], [0], [0], [1], [0, 0, 1, 1], [], []>} : vector<16x96xf32>, vector<96x128xf32>, vector<16x128xf32> -> vector<16x128xf32>
    %c0_3 = arith.constant 0 : index
    %c0_4 = arith.constant 0 : index
    %3 = vector.load %arg3[%c0_3, %c0_4] : memref<1x128xf32, #tpu.memory_space<vmem>>, vector<1x128xf32>
    %4 = vector.broadcast %3 : vector<1x128xf32> to vector<16x128xf32>
    %5 = arith.addf %2, %4 : vector<16x128xf32>
    %c0_5 = arith.constant 0 : index
    %c0_6 = arith.constant 0 : index
    %6 = vector.load %arg4[%c0_5, %c0_6] : memref<16x128xf32, #tpu.memory_space<vmem>>, vector<16x128xf32>
    tpu.vector_store %arg4[%c0_5, %c0_6], %5 {strides = array<i32>} : memref<16x128xf32, #tpu.memory_space<vmem>>, vector<16x128xf32>,
    return
  }
  func.func @transform_0(%arg0: i32) -> (i32, i32) {
    %c0_i32 = arith.constant 0 : i32
    %c0_i32_0 = arith.constant 0 : i32
    return %arg0, %c0_i32 : i32, i32
  }
  func.func @transform_1(%arg0: i32) -> (i32, i32) {
    %c0_i32 = arith.constant 0 : i32
    %c0_i32_0 = arith.constant 0 : i32
    %c0_i32_1 = arith.constant 0 : i32
    return %c0_i32, %c0_i32_0 : i32, i32
  }
  func.func @transform_2(%arg0: i32) -> (i32, i32) {
    %c0_i32 = arith.constant 0 : i32
    %c0_i32_0 = arith.constant 0 : i32
    %c0_i32_1 = arith.constant 0 : i32
    return %c0_i32, %c0_i32_0 : i32, i32
  }
  func.func @transform_3(%arg0: i32) -> (i32, i32) {
    %c0_i32 = arith.constant 0 : i32
    %c0_i32_0 = arith.constant 0 : i32
    return %arg0, %c0_i32 : i32, i32
  }
}

module attributes {stable_mosaic.version = 11 : i64} {
  func.func @_compress_kv_kernel_single(%arg0: i32, %arg1: memref<16x96xf32, #tpu.memory_space<vmem>>, %arg2: memref<96x128xf32, #tpu.memory_space<vmem>>, %arg3: memref<1x128xf32, #tpu.memory_space<vmem>>, %arg4: memref<16x128xf32, #tpu.memory_space<vmem>>) attributes {dimension_semantics = [#tpu.dimension_semantics<parallel>], iteration_bounds = array<i64: 1>, scalar_prefetch = 0 : i64, scratch_operands = 0 : i64, tpu.core_type = #tpu.core_type<tc>, window_params = [{transform_indices = @transform_0, window_bounds = array<i64: 16, 96>}, {pipeline_mode = #tpu.pipeline_mode<synchronous>, transform_indices = @transform_1, window_bounds = array<i64: 96, 128>}, {pipeline_mode = #tpu.pipeline_mode<synchronous>, transform_indices = @transform_2, window_bounds = array<i64: 1, 128>}, {transform_indices = @transform_3, window_bounds = array<i64: 16, 128>}]} {
    %c0 = arith.constant 0 : index
    %c0_0 = arith.constant 0 : index
    %0 = vector.load %arg1[%c0, %c0_0] : memref<16x96xf32, #tpu.memory_space<vmem>>, vector<16x96xf32>
    %c0_1 = arith.constant 0 : index
    %c0_2 = arith.constant 0 : index
    %1 = vector.load %arg2[%c0_1, %c0_2] : memref<96x128xf32, #tpu.memory_space<vmem>>, vector<96x128xf32>
    %cst = arith.constant dense<0.000000e+00> : vector<16x128xf32>
    %2 = tpu.matmul %0, %1, %cst {dimension_numbers = #tpu.dot_dimension_numbers<[1], [0], [0], [1], [0, 0, 1, 1], [], []>} : vector<16x96xf32>, vector<96x128xf32>, vector<16x128xf32> -> vector<16x128xf32>
    %c0_3 = arith.constant 0 : index
    %c0_4 = arith.constant 0 : index
    %3 = vector.load %arg3[%c0_3, %c0_4] : memref<1x128xf32, #tpu.memory_space<vmem>>, vector<1x128xf32>
    %4 = vector.broadcast %3 : vector<1x128xf32> to vector<16x128xf32>
    %5 = arith.addf %2, %4 : vector<16x128xf32>
    %c0_5 = arith.constant 0 : index
    %c0_6 = arith.constant 0 : index
    %6 = vector.load %arg4[%c0_5, %c0_6] : memref<16x128xf32, #tpu.memory_space<vmem>>, vector<16x128xf32>
    tpu.vector_store %arg4[%c0_5, %c0_6], %5 {strides = array<i32>} : memref<16x128xf32, #tpu.memory_space<vmem>>, vector<16x128xf32>,
    return
  }
  func.func @transform_0(%arg0: i32) -> (i32, i32) {
    %c0_i32 = arith.constant 0 : i32
    %c0_i32_0 = arith.constant 0 : i32
    return %arg0, %c0_i32 : i32, i32
  }
  func.func @transform_1(%arg0: i32) -> (i32, i32) {
    %c0_i32 = arith.constant 0 : i32
    %c0_i32_0 = arith.constant 0 : i32
    %c0_i32_1 = arith.constant 0 : i32
    return %c0_i32, %c0_i32_0 : i32, i32
  }
  func.func @transform_2(%arg0: i32) -> (i32, i32) {
    %c0_i32 = arith.constant 0 : i32
    %c0_i32_0 = arith.constant 0 : i32
    %c0_i32_1 = arith.constant 0 : i32
    return %c0_i32, %c0_i32_0 : i32, i32
  }
  func.func @transform_3(%arg0: i32) -> (i32, i32) {
    %c0_i32 = arith.constant 0 : i32
    %c0_i32_0 = arith.constant 0 : i32
    return %arg0, %c0_i32 : i32, i32
  }
}

</mosaic_0001>

<bundles_post_ra>
// kernel: tpu_custom_call.1
= control target key start
LH: loop header
LB: loop body
LE: loop exit
PB: predicated region body
PF: predicated region fallthrough
CT: control target
= control target key end

     0   :  { %8 = vsyncpa [#allocation3], 0  ;;  %s387_s0 = inlined_call_operand.hbm [shape: f32[4,96], index: 0, kind: input, shape index: {}]   ;;  %s388_s1 = inlined_call_operand.hbm [shape: f32[96,128], index: 1, kind: input, shape index: {}]   ;;  %s389_s2 = inlined_call_operand.vmem [shape: f32[1,128], index: 2, kind: input, shape index: {}]   ;;  %s390_s3 = inlined_call_operand.hbm [shape: f32[4,128], index: 3, kind: output, shape index: {}]  }
   0x1   :  { %9 = vsyncpa [#allocation6], 0 }
   0x2   :  { %10 = vsyncpa [#allocation4], 0 }
   0x3   :  { %15 = vsyncadd [#allocation3], 192  ;;  %s313_s12 = smov [#allocation2]   ;;  %s241_s16 = scalar_lea.hbm %s387_s0, 64 }
   0x4   :  { %s16_s13 = sshll.u32 %s313_s12, 4  ;;  %p242_p0 = scmp.ne.s32.totalorder %s387_s0, %s241_s16  ;;  %s17_s13 = int_to_ptr.vmem [resolvable:$true] %s16_s13 }
   0x5   :  { %p245_p1 = scmp.lt.u32.totalorder %s241_s16, %s387_s0 }
   0x7   :  { %p247_p2 = pnand %p245_p1, %p242_p0 }
   0x9   :  { %250 = shalt.err (!%p247_p2)
}
   0xa   :  { %s251_s21 = scalar_lea.vmem %s17_s13, 64  ;;  %s255_s22 = scalar_lea.vmem %s17_s13, 256 }
   0xb   :  { %p252_p3 = scmp.ne.s32.totalorder %s17_s13, %s251_s21  ;;  %p256_p4 = scmp.lt.s32.totalorder %s17_s13, %s17_s13 }
   0xc   :  { %p257_p5 = scmp.lt.s32.totalorder %s255_s22, %s251_s21 }
   0xe   :  { %p258_p6 = por %p257_p5, %p256_p4 }
  0x10   :  { %p259_p7 = pnand %p258_p6, %p252_p3 }
  0x12   :  { %262 = shalt.err (!%p259_p7)
}
  0x13   :  { %s314_s23 = smov 64   ;;  %s315_s24 = smov 4  }
  0x14   :  { %22 = dma.hbm_to_vmem [thread:$0]  %s387_s0, 64, %s17_s13, [#allocation3], %s314_s23, %s314_s23, %s315_s24  }
  0x15   :  { %s316_s27 = smov [#allocation5]   ;;  %s263_s4 = scalar_lea.hbm %s388_s1, 1536 }
  0x16   :  { %s28_s28 = sshll.u32 %s316_s27, 4  ;;  %p264_p8 = scmp.ne.s32.totalorder %s388_s1, %s263_s4  ;;  %s29_s28 = int_to_ptr.vmem [resolvable:$true] %s28_s28 }
  0x17   :  { %p267_p9 = scmp.lt.u32.totalorder %s263_s4, %s388_s1 }
  0x19   :  { %p269_p10 = pnand %p267_p9, %p264_p8 }
  0x1b   :  { %272 = shalt.err (!%p269_p10)
}
  0x1c   :  { %s273_s9 = scalar_lea.vmem %s29_s28, 1536  ;;  %p278_p12 = scmp.lt.s32.totalorder %s29_s28, %s29_s28 }
  0x1d   :  { %p274_p11 = scmp.ne.s32.totalorder %s29_s28, %s273_s9  ;;  %p279_p13 = scmp.lt.s32.totalorder %s273_s9, %s273_s9 }
  0x1f   :  { %p280_p0 = por %p279_p13, %p278_p12 }
  0x21   :  { %p281_p1 = pnand %p280_p0, %p274_p11 }
  0x23   :  { %284 = shalt.err (!%p281_p1)
}
  0x24   :  { %s317_s0 = smov 128   ;;  %s318_s10 = smov 8  }
  0x25   :  { %34 = dma.hbm_to_vmem [thread:$0]  %s388_s1, 1536, %s29_s28, [#allocation6], %s317_s0, %s317_s0, %s318_s10  }
  0x26   :  { %307 = dma.done.wait [#allocation3], 256  }
  0x27   :  { %308 = vsyncadd [#allocation3], 4294967040 }
  0x28   :  { %309 = dma.done.wait [#allocation6], 1536  }
  0x29   :  { %310 = vsyncadd [#allocation6], 4294965760  ;;  %v45_v0 = vld [vmem:[#allocation5] sm:$0xff]  ;;  %v46_v1 = vld [vmem:[#allocation5 + $0x8] sm:$0xff]  ;;  %vm64_vm0 = vcmask 785408  }
  0x2a   :  { %v47_v2 = vld [vmem:[#allocation5 + $0x10] sm:$0xff]  ;;  %v210_v3 = vpack.c.bf16 %v46_v1, %v45_v0  ;;  %v48_v4 = vld [vmem:[#allocation5 + $0x18] sm:$0xff]  ;;  %v49_v6 = vld [vmem:[#allocation5 + $0x20] sm:$0xff] }
  0x2b   :  { %v214_v5 = vpack.c.bf16 %v48_v4, %v47_v2  ;;  %v50_v7 = vld [vmem:[#allocation5 + $0x28] sm:$0xff]  ;;  %v43_v8 = vld [vmem:[#allocation2] sm:$0xff]  ;;  %v52_v11 = vld [vmem:[#allocation5 + $0x38] sm:$0xff] }
  0x2c   :  { %211 = vmatprep.subr.bf16.mxu0 %v210_v3  ;;  %v218_v9 = vpack.c.bf16 %v50_v7, %v49_v6  ;;  %207 = vmatprep.mubr.msk.f32.mxu0 %vm64_vm0, %v43_v8  ;;  %v51_v10 = vld [vmem:[#allocation5 + $0x30] sm:$0xff]  ;;  %v53_v13 = vld [vmem:[#allocation5 + $0x40] sm:$0xff]  ;;  %v54_v14 = vld [vmem:[#allocation5 + $0x48] sm:$0xff] }
  0x2d   :  { %213 = vmatpush3.bf16.msra.mxu0 %v210_v3  ;;  %v222_v12 = vpack.c.bf16 %v52_v11, %v51_v10  ;;  %v226_v15 = vpack.c.bf16 %v54_v14, %v53_v13  ;;  %v55_v16 = vld [vmem:[#allocation5 + $0x50] sm:$0xff]  ;;  %v56_v17 = vld [vmem:[#allocation5 + $0x58] sm:$0xff] }
  0x2e   :  { %215 = vmatprep.subr.bf16.mxu0 %v214_v5  ;;  %v230_v18 = vpack.c.bf16 %v56_v17, %v55_v16  ;;  %v44_v19 = vld [vmem:[#allocation2 + $0x8] sm:$0xff]  ;;  %v166_v20 = vld [vmem:[%s389_s2] ss:$0 sm:$0xff] }
  0x31   :  { %217 = vmatpush3.bf16.msra.mxu0 %v214_v5 }
  0x32   :  { %219 = vmatprep.subr.bf16.mxu0 %v218_v9 }
  0x35   :  { %221 = vmatpush3.bf16.msra.mxu0 %v218_v9 }
  0x36   :  { %223 = vmatprep.subr.bf16.mxu0 %v222_v12 }
  0x39   :  { %225 = vmatpush3.bf16.msra.mxu0 %v222_v12 }
  0x3a   :  { %227 = vmatprep.subr.bf16.mxu0 %v226_v15 }
  0x3d   :  { %229 = vmatpush3.bf16.msra.mxu0 %v226_v15 }
  0x3e   :  { %231 = vmatprep.subr.bf16.mxu0 %v230_v18 }
  0x41   :  { %233 = vmatpush3.bf16.msra.mxu0 %v230_v18 }
  0x44   :  { %208 = vmatmul.mubr.msk.f32.vlgmr.msra.gmra.mrb[0].mxu0 %vm64_vm0, %v44_v19 }
 0x117   :  { %v209_v21 = vpop.f32.mrb[0].mxu0 }
 0x118   :  { %v143_v22 = vadd.f32 %v209_v21, %v166_v20  ;;  %v137_v23 = vpop.f32.mrb[1].mxu0 }
 0x119   :  { %v138_v24 = vadd.f32 %v166_v20, %v137_v23 }
 0x11a   :  { %147 = vst [vmem:[#allocation7 + $0x8] sm:$0xff] %v143_v22 }
 0x11b   :  { %146 = vst [vmem:[#allocation7] sm:$0xff] %v138_v24 }
 0x11c   :  { %152 = vsyncadd [#allocation4], 192  ;;  %s319_s14 = smov [#allocation7]  }
 0x11d   :  { %s153_s15 = sshll.u32 %s319_s14, 4  ;;  %s154_s15 = int_to_ptr.vmem [resolvable:$true] %s153_s15 }
 0x11e   :  { %s285_s16 = scalar_lea.vmem %s154_s15, 64  ;;  %s289_s17 = scalar_lea.vmem %s154_s15, 256 }
 0x11f   :  { %p286_p2 = scmp.ne.s32.totalorder %s154_s15, %s285_s16  ;;  %p290_p3 = scmp.lt.s32.totalorder %s154_s15, %s154_s15 }
 0x120   :  { %p291_p4 = scmp.lt.s32.totalorder %s289_s17, %s285_s16 }
 0x122   :  { %p292_p5 = por %p291_p4, %p290_p3 }
 0x124   :  { %p293_p6 = pnand %p292_p5, %p286_p2 }
 0x126   :  { %296 = shalt.err (!%p293_p6)
}
 0x127   :  { %s297_s19 = scalar_lea.hbm %s390_s3, 64 }
 0x128   :  { %p298_p7 = scmp.ne.s32.totalorder %s390_s3, %s297_s19  ;;  %p301_p8 = scmp.lt.u32.totalorder %s297_s19, %s390_s3 }
 0x12a   :  { %p303_p9 = pnand %p301_p8, %p298_p7 }
 0x12c   :  { %306 = shalt.err (!%p303_p9)
}
 0x12d   :  { %159 = dma.vmem_to_hbm [thread:$0]  %s154_s15, 64, %s390_s3, [#allocation4], %s314_s23, %s314_s23, %s315_s24  }
 0x12e   :  { %311 = dma.done.wait [#allocation4], 256  }
 0x12f   :  { %312 = vsyncadd [#allocation4], 4294967040 }
 0x130   :  { %163 = vsyncpa [#allocation3], 1 }
 0x131   :  { %164 = vsyncpa [#allocation6], 1 }
 0x132   :  { %165 = vsyncpa [#allocation4], 1 }

// kernel: tpu_custom_call.1
= control target key start
LH: loop header
LB: loop body
LE: loop exit
PB: predicated region body
PF: predicated region fallthrough
CT: control target
= control target key end

     0   :  { %8 = vsyncpa [#allocation3], 0  ;;  %s387_s0 = inlined_call_operand.hbm [shape: f32[4,96], index: 0, kind: input, shape index: {}]   ;;  %s388_s1 = inlined_call_operand.hbm [shape: f32[96,128], index: 1, kind: input, shape index: {}]   ;;  %s389_s2 = inlined_call_operand.vmem [shape: f32[1,128], index: 2, kind: input, shape index: {}]   ;;  %s390_s3 = inlined_call_operand.hbm [shape: f32[4,128], index: 3, kind: output, shape index: {}]  }
   0x1   :  { %9 = vsyncpa [#allocation6], 0 }
   0x2   :  { %10 = vsyncpa [#allocation4], 0 }
   0x3   :  { %15 = vsyncadd [#allocation3], 192  ;;  %s313_s12 = smov [#allocation2]   ;;  %s241_s16 = scalar_lea.hbm %s387_s0, 64 }
   0x4   :  { %s16_s13 = sshll.u32 %s313_s12, 4  ;;  %p242_p0 = scmp.ne.s32.totalorder %s387_s0, %s241_s16  ;;  %s17_s13 = int_to_ptr.vmem [resolvable:$true] %s16_s13 }
   0x5   :  { %p245_p1 = scmp.lt.u32.totalorder %s241_s16, %s387_s0 }
   0x7   :  { %p247_p2 = pnand %p245_p1, %p242_p0 }
   0x9   :  { %250 = shalt.err (!%p247_p2)
}
   0xa   :  { %s251_s21 = scalar_lea.vmem %s17_s13, 64  ;;  %s255_s22 = scalar_lea.vmem %s17_s13, 256 }
   0xb   :  { %p252_p3 = scmp.ne.s32.totalorder %s17_s13, %s251_s21  ;;  %p256_p4 = scmp.lt.s32.totalorder %s17_s13, %s17_s13 }
   0xc   :  { %p257_p5 = scmp.lt.s32.totalorder %s255_s22, %s251_s21 }
   0xe   :  { %p258_p6 = por %p257_p5, %p256_p4 }
  0x10   :  { %p259_p7 = pnand %p258_p6, %p252_p3 }
  0x12   :  { %262 = shalt.err (!%p259_p7)
}
  0x13   :  { %s314_s23 = smov 64   ;;  %s315_s24 = smov 4  }
  0x14   :  { %22 = dma.hbm_to_vmem [thread:$0]  %s387_s0, 64, %s17_s13, [#allocation3], %s314_s23, %s314_s23, %s315_s24  }
  0x15   :  { %s316_s27 = smov [#allocation5]   ;;  %s263_s4 = scalar_lea.hbm %s388_s1, 1536 }
  0x16   :  { %s28_s28 = sshll.u32 %s316_s27, 4  ;;  %p264_p8 = scmp.ne.s32.totalorder %s388_s1, %s263_s4  ;;  %s29_s28 = int_to_ptr.vmem [resolvable:$true] %s28_s28 }
  0x17   :  { %p267_p9 = scmp.lt.u32.totalorder %s263_s4, %s388_s1 }
  0x19   :  { %p269_p10 = pnand %p267_p9, %p264_p8 }
  0x1b   :  { %272 = shalt.err (!%p269_p10)
}
  0x1c   :  { %s273_s9 = scalar_lea.vmem %s29_s28, 1536  ;;  %p278_p12 = scmp.lt.s32.totalorder %s29_s28, %s29_s28 }
  0x1d   :  { %p274_p11 = scmp.ne.s32.totalorder %s29_s28, %s273_s9  ;;  %p279_p13 = scmp.lt.s32.totalorder %s273_s9, %s273_s9 }
  0x1f   :  { %p280_p0 = por %p279_p13, %p278_p12 }
  0x21   :  { %p281_p1 = pnand %p280_p0, %p274_p11 }
  0x23   :  { %284 = shalt.err (!%p281_p1)
}
  0x24   :  { %s317_s0 = smov 128   ;;  %s318_s10 = smov 8  }
  0x25   :  { %34 = dma.hbm_to_vmem [thread:$0]  %s388_s1, 1536, %s29_s28, [#allocation6], %s317_s0, %s317_s0, %s318_s10  }
  0x26   :  { %307 = dma.done.wait [#allocation3], 256  }
  0x27   :  { %308 = vsyncadd [#allocation3], 4294967040 }
  0x28   :  { %309 = dma.done.wait [#allocation6], 1536  }
  0x29   :  { %310 = vsyncadd [#allocation6], 4294965760  ;;  %v45_v0 = vld [vmem:[#allocation5] sm:$0xff]  ;;  %v46_v1 = vld [vmem:[#allocation5 + $0x8] sm:$0xff]  ;;  %vm64_vm0 = vcmask 785408  }
  0x2a   :  { %v47_v2 = vld [vmem:[#allocation5 + $0x10] sm:$0xff]  ;;  %v210_v3 = vpack.c.bf16 %v46_v1, %v45_v0  ;;  %v48_v4 = vld [vmem:[#allocation5 + $0x18] sm:$0xff]  ;;  %v49_v6 = vld [vmem:[#allocation5 + $0x20] sm:$0xff] }
  0x2b   :  { %v214_v5 = vpack.c.bf16 %v48_v4, %v47_v2  ;;  %v50_v7 = vld [vmem:[#allocation5 + $0x28] sm:$0xff]  ;;  %v43_v8 = vld [vmem:[#allocation2] sm:$0xff]  ;;  %v52_v11 = vld [vmem:[#allocation5 + $0x38] sm:$0xff] }
  0x2c   :  { %211 = vmatprep.subr.bf16.mxu0 %v210_v3  ;;  %v218_v9 = vpack.c.bf16 %v50_v7, %v49_v6  ;;  %207 = vmatprep.mubr.msk.f32.mxu0 %vm64_vm0, %v43_v8  ;;  %v51_v10 = vld [vmem:[#allocation5 + $0x30] sm:$0xff]  ;;  %v53_v13 = vld [vmem:[#allocation5 + $0x40] sm:$0xff]  ;;  %v54_v14 = vld [vmem:[#allocation5 + $0x48] sm:$0xff] }
  0x2d   :  { %213 = vmatpush3.bf16.msra.mxu0 %v210_v3  ;;  %v222_v12 = vpack.c.bf16 %v52_v11, %v51_v10  ;;  %v226_v15 = vpack.c.bf16 %v54_v14, %v53_v13  ;;  %v55_v16 = vld [vmem:[#allocation5 + $0x50] sm:$0xff]  ;;  %v56_v17 = vld [vmem:[#allocation5 + $0x58] sm:$0xff] }
  0x2e   :  { %215 = vmatprep.subr.bf16.mxu0 %v214_v5  ;;  %v230_v18 = vpack.c.bf16 %v56_v17, %v55_v16  ;;  %v44_v19 = vld [vmem:[#allocation2 + $0x8] sm:$0xff]  ;;  %v166_v20 = vld [vmem:[%s389_s2] ss:$0 sm:$0xff] }
  0x31   :  { %217 = vmatpush3.bf16.msra.mxu0 %v214_v5 }
  0x32   :  { %219 = vmatprep.subr.bf16.mxu0 %v218_v9 }
  0x35   :  { %221 = vmatpush3.bf16.msra.mxu0 %v218_v9 }
  0x36   :  { %223 = vmatprep.subr.bf16.mxu0 %v222_v12 }
  0x39   :  { %225 = vmatpush3.bf16.msra.mxu0 %v222_v12 }
  0x3a   :  { %227 = vmatprep.subr.bf16.mxu0 %v226_v15 }
  0x3d   :  { %229 = vmatpush3.bf16.msra.mxu0 %v226_v15 }
  0x3e   :  { %231 = vmatprep.subr.bf16.mxu0 %v230_v18 }
  0x41   :  { %233 = vmatpush3.bf16.msra.mxu0 %v230_v18 }
  0x44   :  { %208 = vmatmul.mubr.msk.f32.vlgmr.msra.gmra.mrb[0].mxu0 %vm64_vm0, %v44_v19 }
 0x117   :  { %v209_v21 = vpop.f32.mrb[0].mxu0 }
 0x118   :  { %v143_v22 = vadd.f32 %v209_v21, %v166_v20  ;;  %v137_v23 = vpop.f32.mrb[1].mxu0 }
 0x119   :  { %v138_v24 = vadd.f32 %v166_v20, %v137_v23 }
 0x11a   :  { %147 = vst [vmem:[#allocation7 + $0x8] sm:$0xff] %v143_v22 }
 0x11b   :  { %146 = vst [vmem:[#allocation7] sm:$0xff] %v138_v24 }
 0x11c   :  { %152 = vsyncadd [#allocation4], 192  ;;  %s319_s14 = smov [#allocation7]  }
 0x11d   :  { %s153_s15 = sshll.u32 %s319_s14, 4  ;;  %s154_s15 = int_to_ptr.vmem [resolvable:$true] %s153_s15 }
 0x11e   :  { %s285_s16 = scalar_lea.vmem %s154_s15, 64  ;;  %s289_s17 = scalar_lea.vmem %s154_s15, 256 }
 0x11f   :  { %p286_p2 = scmp.ne.s32.totalorder %s154_s15, %s285_s16  ;;  %p290_p3 = scmp.lt.s32.totalorder %s154_s15, %s154_s15 }
 0x120   :  { %p291_p4 = scmp.lt.s32.totalorder %s289_s17, %s285_s16 }
 0x122   :  { %p292_p5 = por %p291_p4, %p290_p3 }
 0x124   :  { %p293_p6 = pnand %p292_p5, %p286_p2 }
 0x126   :  { %296 = shalt.err (!%p293_p6)
}
 0x127   :  { %s297_s19 = scalar_lea.hbm %s390_s3, 64 }
 0x128   :  { %p298_p7 = scmp.ne.s32.totalorder %s390_s3, %s297_s19  ;;  %p301_p8 = scmp.lt.u32.totalorder %s297_s19, %s390_s3 }
 0x12a   :  { %p303_p9 = pnand %p301_p8, %p298_p7 }
 0x12c   :  { %306 = shalt.err (!%p303_p9)
}
 0x12d   :  { %159 = dma.vmem_to_hbm [thread:$0]  %s154_s15, 64, %s390_s3, [#allocation4], %s314_s23, %s314_s23, %s315_s24  }
 0x12e   :  { %311 = dma.done.wait [#allocation4], 256  }
 0x12f   :  { %312 = vsyncadd [#allocation4], 4294967040 }
 0x130   :  { %163 = vsyncpa [#allocation3], 1 }
 0x131   :  { %164 = vsyncpa [#allocation6], 1 }
 0x132   :  { %165 = vsyncpa [#allocation4], 1 }

</bundles_post_ra>
